<compile_context>
chip_gen: v7x
topology: tpu7x:2x2x1
jax: 0.10.0
libtpu: 0.0.40
codegen_flags: <defaults>
</compile_context>

<pallas_src>
import functools

import jax
import jax.numpy as jnp
import numpy as np
from jax.experimental import pallas as pl
from jax.experimental.pallas import tpu as pltpu

LANES = 128
SUBLANES = 8

# ------------------------------------------------------------------ config (replaces the yaml)
CONFIG = {
    "cond_type": "class",   # 'class' or 'numeric'
    "num_cond": 10,         # number of classes (class) / numeric feature count (numeric)
    "embed_dim": 32,
    "cond_dim": 64,
}


def _round_up(x, m):
    return (x + m - 1) // m * m


def _gelu_exact(x):
    # PyTorch nn.GELU() default: 0.5 * x * (1 + erf(x / sqrt(2)))
    return 0.5 * x * (1.0 + jax.lax.erf(x * np.float32(1.0 / np.sqrt(2.0))))


def _pad_block(a, n_rows, n_cols):
    """Zero-pad a 2D f32 array into an (n_rows, n_cols) block."""
    a = jnp.asarray(a, jnp.float32)
    return jnp.zeros((n_rows, n_cols), jnp.float32).at[: a.shape[0], : a.shape[1]].set(a)


def _numeric_layout(num_cond, embed_dim, cond_dim):
    """Row offsets of each segment inside the packed numeric weight buffer (width W)."""
    W = _round_up(max(embed_dim, cond_dim), SUBLANES)
    Kp = _round_up(num_cond, SUBLANES)
    off = {}
    off["we"] = 0
    off["be"] = Kp
    off["w1"] = off["be"] + SUBLANES
    off["b1"] = off["w1"] + W
    off["w2"] = off["b1"] + SUBLANES
    off["b2"] = off["w2"] + W
    total = off["b2"] + SUBLANES
    return W, Kp, off, total


# ------------------------------------------------------------------ parameter packing
def pack_params(params, *, cond_type, num_cond, embed_dim, cond_dim):
    if cond_type == "class":
        # Fold the whole MLP into a lookup table (exact: one-hot matmul selects a row).
        table = (_gelu_exact(jnp.asarray(params["emb"], jnp.float32)
                             @ params["w1"] + params["b1"])
                 @ params["w2"] + params["b2"])                    # (num_cond, cond_dim)
        return _pad_block(table, _round_up(num_cond, SUBLANES), cond_dim)
    if cond_type == "numeric":
        W, Kp, _, _ = _numeric_layout(num_cond, embed_dim, cond_dim)
        blocks = [
            _pad_block(params["we"], Kp, W),
            _pad_block(params["be"], SUBLANES, W),
            _pad_block(params["w1"], W, W),
            _pad_block(params["b1"], SUBLANES, W),
            _pad_block(params["w2"], W, W),
            _pad_block(params["b2"], SUBLANES, W),
        ]
        return jnp.concatenate(blocks, axis=0)
    raise ValueError(cond_type)


# ------------------------------------------------------------------ forward
@functools.partial(jax.jit,
                   static_argnames=("cond_type", "num_cond", "embed_dim", "cond_dim", "tile_b"))
def condition_encoder_forward(y, packed, *, cond_type, num_cond, embed_dim, cond_dim,
                              tile_b=2048):
    assert tile_b % SUBLANES == 0
    B = y.shape[0]

    if cond_type == "class":
        e_rows = _round_up(num_cond, SUBLANES)
        assert packed.shape == (e_rows, cond_dim), packed.shape

        def kernel(y_ref, p_ref, o_ref):
            tb = y_ref.shape[0]
            iota = jax.lax.broadcasted_iota(jnp.int32, (tb, e_rows), 1)
            onehot = (y_ref[...] == iota).astype(jnp.float32)          # (tb, e_rows)
            # single MXU matmul against the pre-folded MLP table
            o_ref[...] = jnp.dot(onehot, p_ref[...], preferred_element_type=jnp.float32)

        y_cols = 1
    elif cond_type == "numeric":
        W, Kp, off, total_rows = _numeric_layout(num_cond, embed_dim, cond_dim)
        assert packed.shape == (total_rows, W), packed.shape

        def kernel(y_ref, p_ref, o_ref):
            e = (jnp.dot(y_ref[...], p_ref[off["we"]:off["we"] + Kp, :],
                         preferred_element_type=jnp.float32)
                 + p_ref[off["be"]:off["be"] + 1, :])
            h = (jnp.dot(e, p_ref[off["w1"]:off["w1"] + W, :],
                         preferred_element_type=jnp.float32)
                 + p_ref[off["b1"]:off["b1"] + 1, :])
            h = _gelu_exact(h)
            out = (jnp.dot(h, p_ref[off["w2"]:off["w2"] + W, :],
                           preferred_element_type=jnp.float32)
                   + p_ref[off["b2"]:off["b2"] + 1, :])
            o_ref[...] = out[:, :cond_dim]

        y_cols = Kp
    else:
        raise ValueError(cond_type)

    if B <= tile_b:
        # Small batch: grid-less call, whole (tiny) arrays resident in VMEM, one DMA each.
        # Working set at B<=2048 is < 1 MiB, well under every generation's scoped-VMEM default.
        Bp = _round_up(max(B, SUBLANES), SUBLANES)
        if cond_type == "class":
            y_in = jnp.pad(y.astype(jnp.int32), (0, Bp - B),
                           constant_values=-1).reshape(Bp, 1)           # -1 => zero table row
        else:
            y_in = jnp.pad(y.astype(jnp.float32), ((0, Bp - B), (0, y_cols - num_cond)))
        out = pl.pallas_call(
            kernel,
            out_shape=jax.ShapeDtypeStruct((Bp, cond_dim), jnp.float32),
            in_specs=[pl.BlockSpec(memory_space=pltpu.MemorySpace.VMEM),
                      pl.BlockSpec(memory_space=pltpu.MemorySpace.VMEM)],
            out_specs=pl.BlockSpec(memory_space=pltpu.MemorySpace.VMEM),
        )(y_in, packed)
        return out[:B]

    # Large batch: batch axis becomes a parallel grid axis (B > tile_b guarantees >= 2 steps,
    # keeping both v7x TensorCores busy); packed weights stay resident (constant index_map).
    # No wrapper row padding: Pallas clips the ragged last block (OOB reads -> garbage rows
    # that are dropped on write; numeric garbage may be NaN/Inf, harmless on TPU).
    if cond_type == "class":
        y_in = y.astype(jnp.int32).reshape(B, 1)
    else:
        y_in = jnp.pad(y.astype(jnp.float32), ((0, 0), (0, y_cols - num_cond)))
    out = pl.pallas_call(
        kernel,
        out_shape=jax.ShapeDtypeStruct((B, cond_dim), jnp.float32),
        grid=(pl.cdiv(B, tile_b),),
        in_specs=[pl.BlockSpec((tile_b, y_cols), lambda i: (i, 0)),
                  pl.BlockSpec(packed.shape, lambda i: (0, 0))],
        out_specs=pl.BlockSpec((tile_b, cond_dim), lambda i: (i, 0)),
        compiler_params=pltpu.CompilerParams(dimension_semantics=("parallel",)),
    )(y_in, packed)
    return out


# ------------------------------------------------------------------ param init (deterministic)
def init_params(key, config):
    num_cond = config["num_cond"]
    embed_dim = config["embed_dim"]
    cond_dim = config["cond_dim"]
    keys = jax.random.split(key, 8)
    params = {}
    if config["cond_type"] == "class":
        params["emb"] = jax.random.normal(keys[0], (num_cond, embed_dim), jnp.float32)
    else:
        lim = 1.0 / np.sqrt(num_cond)
        params["we"] = jax.random.uniform(keys[0], (num_cond, embed_dim), jnp.float32, -lim, lim)
        params["be"] = jax.random.uniform(keys[1], (1, embed_dim), jnp.float32, -lim, lim)
    lim1 = 1.0 / np.sqrt(embed_dim)
    params["w1"] = jax.random.uniform(keys[2], (embed_dim, cond_dim), jnp.float32, -lim1, lim1)
    params["b1"] = jax.random.uniform(keys[3], (1, cond_dim), jnp.float32, -lim1, lim1)
    lim2 = 1.0 / np.sqrt(cond_dim)
    params["w2"] = jax.random.uniform(keys[4], (cond_dim, cond_dim), jnp.float32, -lim2, lim2)
    params["b2"] = jax.random.uniform(keys[5], (1, cond_dim), jnp.float32, -lim2, lim2)
    return params


# ------------------------------------------------------------------ pure-JAX reference
def reference_forward(y, params, cond_type):
    if cond_type == "class":
        e = params["emb"][y.astype(jnp.int32)]
    else:
        e = y.astype(jnp.float32) @ params["we"] + params["be"]
    h = e @ params["w1"] + params["b1"]
    h = _gelu_exact(h)
    return h @ params["w2"] + params["b2"]


if __name__ == "__main__":
    key = jax.random.PRNGKey(0)

    # ---- 'class' conditioning, small batch (grid-less VMEM path) ----
    cfg = dict(CONFIG)
    p_cls = init_params(jax.random.fold_in(key, 1), cfg)
    packed_cls = pack_params(p_cls, cond_type="class", num_cond=cfg["num_cond"],
                             embed_dim=cfg["embed_dim"], cond_dim=cfg["cond_dim"])
    y_cls = jax.random.randint(jax.random.fold_in(key, 2), (8,), 0, cfg["num_cond"], jnp.int32)
    out_cls = condition_encoder_forward(
        y_cls, packed_cls, cond_type="class", num_cond=cfg["num_cond"],
        embed_dim=cfg["embed_dim"], cond_dim=cfg["cond_dim"])
    jax.block_until_ready(out_cls)
    np.testing.assert_allclose(np.asarray(out_cls),
                               np.asarray(reference_forward(y_cls, p_cls, "class")),
                               rtol=1e-5, atol=1e-5)

    # ---- 'numeric' conditioning, small batch (grid-less VMEM path) ----
    cfg_num = dict(CONFIG)
    cfg_num["cond_type"] = "numeric"
    cfg_num["num_cond"] = 4
    p_num = init_params(jax.random.fold_in(key, 3), cfg_num)
    packed_num = pack_params(p_num, cond_type="numeric", num_cond=cfg_num["num_cond"],
                             embed_dim=cfg_num["embed_dim"], cond_dim=cfg_num["cond_dim"])
    y_num = jax.random.normal(jax.random.fold_in(key, 4), (8, cfg_num["num_cond"]), jnp.float32)
    out_num = condition_encoder_forward(
        y_num, packed_num, cond_type="numeric", num_cond=cfg_num["num_cond"],
        embed_dim=cfg_num["embed_dim"], cond_dim=cfg_num["cond_dim"])
    jax.block_until_ready(out_num)
    np.testing.assert_allclose(np.asarray(out_num),
                               np.asarray(reference_forward(y_num, p_num, "numeric")),
                               rtol=1e-5, atol=1e-5)

    # ---- 'class', large batch (parallel grid path with ragged last block) ----
    y_big = jax.random.randint(jax.random.fold_in(key, 5), (5000,), 0, cfg["num_cond"], jnp.int32)
    out_big = condition_encoder_forward(
        y_big, packed_cls, cond_type="class", num_cond=cfg["num_cond"],
        embed_dim=cfg["embed_dim"], cond_dim=cfg["cond_dim"], tile_b=2048)
    jax.block_until_ready(out_big)
    np.testing.assert_allclose(np.asarray(out_big),
                               np.asarray(reference_forward(y_big, p_cls, "class")),
                               rtol=1e-5, atol=1e-5)

    # ---- 'numeric', large batch (grid path with ragged last block) ----
    y_nbig = jax.random.normal(jax.random.fold_in(key, 6), (1300, cfg_num["num_cond"]), jnp.float32)
    out_nbig = condition_encoder_forward(
        y_nbig, packed_num, cond_type="numeric", num_cond=cfg_num["num_cond"],
        embed_dim=cfg_num["embed_dim"], cond_dim=cfg_num["cond_dim"], tile_b=512)
    jax.block_until_ready(out_nbig)
    np.testing.assert_allclose(np.asarray(out_nbig),
                               np.asarray(reference_forward(y_nbig, p_num, "numeric")),
                               rtol=1e-5, atol=1e-5)

    print("KERNEL_OK")
</pallas_src>

<mosaic_0001>
module attributes {stable_mosaic.version = 11 : i64} {
  func.func @kernel(%arg0: memref<8x1xi32, #tpu.memory_space<vmem>>, %arg1: memref<16x64xf32, #tpu.memory_space<vmem>>, %arg2: memref<8x64xf32, #tpu.memory_space<vmem>>) attributes {dimension_semantics = [], scalar_prefetch = 0 : i64, scratch_operands = 0 : i64, tpu.core_type = #tpu.core_type<tc>} {
    %0 = tpu.iota {dimensions = array<i32: 1>} : vector<8x16xi32>
    %c0 = arith.constant 0 : index
    %c0_0 = arith.constant 0 : index
    %1 = vector.load %arg0[%c0, %c0_0] : memref<8x1xi32, #tpu.memory_space<vmem>>, vector<8x1xi32>
    %2 = vector.broadcast %1 : vector<8x1xi32> to vector<8x16xi32>
    %3 = arith.cmpi eq, %2, %0 : vector<8x16xi32>
    %4 = arith.extui %3 : vector<8x16xi1> to vector<8x16xi32>
    %5 = arith.sitofp %4 : vector<8x16xi32> to vector<8x16xf32>
    %c0_1 = arith.constant 0 : index
    %c0_2 = arith.constant 0 : index
    %6 = vector.load %arg1[%c0_1, %c0_2] : memref<16x64xf32, #tpu.memory_space<vmem>>, vector<16x64xf32>
    %cst = arith.constant dense<0.000000e+00> : vector<8x64xf32>
    %7 = tpu.matmul %5, %6, %cst {dimension_numbers = #tpu.dot_dimension_numbers<[1], [0], [0], [1], [0, 0, 1, 1], [], []>} : vector<8x16xf32>, vector<16x64xf32>, vector<8x64xf32> -> vector<8x64xf32>
    %c0_3 = arith.constant 0 : index
    %c0_4 = arith.constant 0 : index
    %8 = vector.load %arg2[%c0_3, %c0_4] : memref<8x64xf32, #tpu.memory_space<vmem>>, vector<8x64xf32>
    tpu.vector_store %arg2[%c0_3, %c0_4], %7 {strides = array<i32>} : memref<8x64xf32, #tpu.memory_space<vmem>>, vector<8x64xf32>,
    return
  }
}

</mosaic_0001>

<bundles_post_ra>
// kernel: condition_encoder_forward.1
= control target key start
LH: loop header
LB: loop body
LE: loop exit
PB: predicated region body
PF: predicated region fallthrough
CT: control target
= control target key end

     0   :  { %v158_v3 = vmov 0   ;;  %v159_v4 = vmov 0.0|0.0   ;;  %s199_s0 = inlined_call_operand.vmem [shape: s32[8,1], index: 0, kind: input, shape index: {}]   ;;  %s200_s1 = inlined_call_operand.vmem [shape: f32[16,64], index: 1, kind: input, shape index: {}]   ;;  %s201_s2 = inlined_call_operand.hbm [shape: f32[8,64], index: 2, kind: output, shape index: {}]  }
   0x1   :  { %v14_v0 = vld [vmem:[%s199_s0] sm:$0xff]  ;;  %v22_v2 = vld [vmem:[%s200_s1 + $0x8] sm:$0xff]  ;;  %133 = vset.pattern.permute.xlu0 %v158_v3  ;;  %125 = vmatprep.subr.bf16.mxu0 %v159_v4 }
   0x2   :  { %v21_v1 = vld [vmem:[%s200_s1] sm:$0xff] }
   0x3   :  { %v126_v5 = vpack.c.bf16 %v22_v2, %v21_v1 }
   0x4   :  { %7 = vsyncpa [#allocation3], 0  ;;  %16 = vperm.xlu0 %133, %v14_v0   ;;  %vm160_vm0 = vmmov 0   ;;  %v161_v6 = vmov 0.0   ;;  %v12_v7 = vlaneseq  ;;  %vm23_vm1 = vcmask 130048   ;;  %s162_s0 = smov [#allocation2]  }
   0x5   :  { %127 = vmatpush3.bf16.msra.mxu0 %v126_v5  ;;  %122 = vmatprep.mubr.msk.f32.mxu0 %vm160_vm0, %v161_v6  ;;  %s105_s1 = sshll.u32 %s162_s0, 4  ;;  %vm97_vm3 = vcmask 523264   ;;  %s106_s1 = int_to_ptr.vmem [resolvable:$true] %s105_s1 }
   0x6   :  { %v13_v8 = vand.u32 127, %v12_v7  ;;  %s134_s15 = scalar_lea.vmem %s106_s1, 128  ;;  %p139_p1 = scmp.lt.s32.totalorder %s106_s1, %s106_s1 }
   0x7   :  { %p135_p0 = scmp.ne.s32.totalorder %s106_s1, %s134_s15  ;;  %p140_p2 = scmp.lt.s32.totalorder %s134_s15, %s134_s15 }
   0x9   :  { %p141_p3 = por %p140_p2, %p139_p1 }
   0xb   :  { %p142_p4 = pnand %p141_p3, %p135_p0 }
  0x83   :  { %v17_v9 = vpop.permute.xlu0 %16 }
  0x84   :  { %vm18_vm2 = vcmp.eq.s32.totalorder %v17_v9, %v13_v8 }
  0x85   :  { %v113_v10 = vsel %vm18_vm2, 1.0, %v161_v6 }
  0x86   :  { %123 = vmatmul.mubr.msk.f32.vlgmr.msra.gmra.mrb[0].mxu0 %vm23_vm1, %v113_v10 }
 0x159   :  { %v93_v11 = vpop.f32.mrb[0].mxu0 }
 0x15a   :  { %98 = vst.msk [vmem:[#allocation2] sm:$0xff] %vm97_vm3, %v93_v11  ;;  %v124_v12 = vpop.f32.mrb[1].mxu0 }
 0x15b   :  { %145 = shalt.err (!%p142_p4)
}
 0x15c   :  { %s146_s18 = scalar_lea.hbm %s201_s2, 128 }
 0x15d   :  { %p147_p5 = scmp.ne.s32.totalorder %s201_s2, %s146_s18  ;;  %p150_p6 = scmp.lt.u32.totalorder %s146_s18, %s201_s2 }
 0x15f   :  { %p152_p7 = pnand %p150_p6, %p147_p5 }
 0x161   :  { %155 = shalt.err (!%p152_p7)
}
 0x162   :  { %108 = dma.vmem_to_hbm [thread:$0]  %s106_s1, 128, %s201_s2, [#allocation3]  }
 0x163   :  { %156 = dma.done.wait [#allocation3], 128  }
 0x164   :  { %157 = vsyncadd [#allocation3], 4294967168 }
 0x165   :  { %112 = vsyncpa [#allocation3], 1 }

</bundles_post_ra>
